<compile_context>
chip_gen: v5e
topology: v5e:2x2
jax: 0.10.0
libtpu: 0.0.40
codegen_flags: <defaults>
</compile_context>

<pallas_src>
import functools

import jax
import jax.numpy as jnp
from jax.experimental import pallas as pl
from jax.experimental.pallas import tpu as pltpu


def _round_up(a, m):
    return ((a + m - 1) // m) * m


def _sublane_align(*dtypes):
    """Second-to-last block-dim multiple required per dtype (f32:8, bf16:16, 8-bit:32)."""
    return max(8 * (4 // jnp.dtype(d).itemsize) for d in dtypes)


def _pick_batch_tile(batch, d_in, h_pad, o, x_itemsize, cdt_itemsize,
                     out_itemsize, align, *, target_tile_bytes=1 << 20,
                     vmem_budget=40 << 20):
    """Pick a batch tile sized by bytes, with >=2 grid steps and a VMEM budget."""
    # ~target_tile_bytes of x per grid step amortizes the ~0.35us per-step overhead.
    tb = _round_up(max(align, target_tile_bytes // max(1, d_in * x_itemsize)), align)
    # Keep at least 2 grid steps (pipelining + v7x megacore) when the batch allows.
    if batch > align:
        tb = min(tb, _round_up(-(-batch // 2), align))
    tb = max(align, min(tb, _round_up(batch, align)))

    def footprint(t):
        x_blk = 2 * t * d_in * x_itemsize                    # double-buffered x tile
        o_blk = 2 * t * o * out_itemsize                     # double-buffered out tile
        wts = 2 * (d_in * h_pad + h_pad * o) * cdt_itemsize  # resident (double-buffered) weights
        wts += 2 * (h_pad + o) * 4                           # f32 biases
        inter = t * h_pad * 4 + t * o * 4                    # f32 h and z live values
        return x_blk + o_blk + wts + inter

    # Fit the smallest per-core VMEM (v7x: 64 MiB) with headroom under the 48 MiB limit.
    while tb > align and footprint(tb) > vmem_budget:
        tb = max(align, _round_up(tb // 2, align))
    return tb


def wnet_kernel(x_ref, w1_ref, b1_ref, w2_ref, b2_ref, o_ref, *, approx_recip):
    # x_ref : (TB, D_in)        w1_ref: (D_in, H_pad)   b1_ref: (1, H_pad) f32
    # w2_ref: (H_pad, O)        b2_ref: (1, O) f32      o_ref : (TB, O)
    #
    # Cast the x tile to the MXU compute dtype in-kernel: this avoids an extra
    # HBM cast pass over x in the wrapper when the caller holds x in f32.
    x = x_ref[...].astype(w1_ref.dtype)

    # linear1: f32 accumulation on the MXU, bias add in f32 (no bf16 VPU on v5e).
    h = jnp.dot(x, w1_ref[...], preferred_element_type=jnp.float32) + b1_ref[...]

    # linear2: operands in the compute dtype, f32 accumulation, f32 bias add.
    z = jnp.dot(h.astype(w2_ref.dtype), w2_ref[...],
                preferred_element_type=jnp.float32) + b2_ref[...]

    # sigmoid in f32: exp goes to the EUP slot; the reciprocal is approximate
    # only on the low-precision path (error far below a bf16 ulp).
    o_ref[...] = pl.reciprocal(1.0 + jnp.exp(-z),
                               approx=approx_recip).astype(o_ref.dtype)


def prepare_wnet_params(w1, b1, w2, b2, *, compute_dtype=jnp.bfloat16):
    """Transpose / cast / lane-pad the weights ONCE (hoist out of the hot loop).

    w1: (H, D_in)  b1: (H,)   w2: (O, H)  b2: (O,)
    Returns (W1^T, b1, W2^T, b2) with the hidden axis zero-padded to a multiple
    of 128 so both matmuls see a lane-dense hidden dimension (exact padding).
    """
    H, D_in = w1.shape
    O, H2 = w2.shape
    assert H2 == H, "w2's contraction axis must match w1's output axis"
    H_pad = _round_up(H, 128)

    w1t = jnp.pad(jnp.asarray(w1, compute_dtype).T, ((0, 0), (0, H_pad - H)))
    w2t = jnp.pad(jnp.asarray(w2, compute_dtype).T, ((0, H_pad - H), (0, 0)))
    b1r = jnp.pad(jnp.asarray(b1, jnp.float32).reshape(1, H),
                  ((0, 0), (0, H_pad - H)))
    b2r = jnp.asarray(b2, jnp.float32).reshape(1, O)
    return w1t, b1r, w2t, b2r


def wnet_apply(x, params, *, block_b=None, out_dtype=None):
    """Fused WNet forward with pre-prepared params.  x: (B, D_in)."""
    w1t, b1r, w2t, b2r = params
    B, D_in = x.shape
    D_in_w, H_pad = w1t.shape
    H_pad_w, O = w2t.shape
    assert D_in_w == D_in and H_pad_w == H_pad

    compute_dtype = jnp.dtype(w1t.dtype)
    out_dtype = jnp.dtype(compute_dtype if out_dtype is None else out_dtype)
    cdt_itemsize = compute_dtype.itemsize
    align = _sublane_align(x.dtype, out_dtype)

    if block_b is None:
        tb = _pick_batch_tile(B, D_in, H_pad, O, x.dtype.itemsize,
                              cdt_itemsize, out_dtype.itemsize, align)
    else:
        tb = _round_up(min(block_b, _round_up(B, align)), align)
    grid = (pl.cdiv(B, tb),)   # partial last tile is masked; no batch padding

    flops = 2 * B * (D_in * H_pad + H_pad * O)
    transcendentals = B * O                               # one exp per output
    bytes_accessed = (x.size * x.dtype.itemsize
                      + (w1t.size + w2t.size) * cdt_itemsize
                      + (b1r.size + b2r.size) * 4
                      + B * O * out_dtype.itemsize)

    kernel = functools.partial(
        wnet_kernel,
        approx_recip=(compute_dtype != jnp.dtype(jnp.float32)))

    return pl.pallas_call(
        kernel,
        out_shape=jax.ShapeDtypeStruct((B, O), out_dtype),
        grid=grid,
        in_specs=[
            pl.BlockSpec((tb, D_in), lambda i: (i, 0)),      # x tile  (pipelined)
            pl.BlockSpec((D_in, H_pad), lambda i: (0, 0)),   # W1^T    (resident)
            pl.BlockSpec((1, H_pad), lambda i: (0, 0)),      # b1      (f32)
            pl.BlockSpec((H_pad, O), lambda i: (0, 0)),      # W2^T    (resident)
            pl.BlockSpec((1, O), lambda i: (0, 0)),          # b2      (f32)
        ],
        out_specs=pl.BlockSpec((tb, O), lambda i: (i, 0)),
        compiler_params=pltpu.CompilerParams(
            dimension_semantics=("parallel",),
            vmem_limit_bytes=48 * 1024 * 1024),
        cost_estimate=pl.CostEstimate(
            flops=flops,
            transcendentals=transcendentals,
            bytes_accessed=bytes_accessed),
    )(x, w1t, b1r, w2t, b2r)


def wnet(x, w1, b1, w2, b2, *, compute_dtype=jnp.bfloat16, block_b=None,
         out_dtype=None):
    """Convenience one-shot wrapper (prepares params every call; hot loops
    should call prepare_wnet_params() once and then wnet_apply())."""
    params = prepare_wnet_params(w1, b1, w2, b2, compute_dtype=compute_dtype)
    return wnet_apply(x, params, block_b=block_b, out_dtype=out_dtype)


def wnet_ref(x, w1, b1, w2, b2):
    """Pure-JAX reference mirroring the PyTorch forward."""
    h = x @ w1.T + b1
    z = h @ w2.T + b2
    return jax.nn.sigmoid(z)


if __name__ == "__main__":
    # Small shapes consistent with WNet(input, hidden, output):
    B, D_IN, HID, OUT = 32, 16, 32, 8

    key = jax.random.PRNGKey(0)
    kx, kw1, kb1, kw2, kb2, kx2 = jax.random.split(key, 6)

    x = jax.random.normal(kx, (B, D_IN), dtype=jnp.float32)
    w1 = jax.random.normal(kw1, (HID, D_IN), dtype=jnp.float32) / jnp.sqrt(D_IN)
    b1 = jax.random.normal(kb1, (HID,), dtype=jnp.float32) * 0.1
    w2 = jax.random.normal(kw2, (OUT, HID), dtype=jnp.float32) / jnp.sqrt(HID)
    b2 = jax.random.normal(kb2, (OUT,), dtype=jnp.float32) * 0.1

    ref = wnet_ref(x, w1, b1, w2, b2)

    # 1) Exact f32 path: small explicit tile -> 4 pipelined grid steps, f32 out.
    params_f32 = prepare_wnet_params(w1, b1, w2, b2, compute_dtype=jnp.float32)
    out_f32 = jax.block_until_ready(
        wnet_apply(x, params_f32, block_b=8, out_dtype=jnp.float32))
    assert out_f32.shape == (B, OUT)
    assert out_f32.dtype == jnp.float32
    assert jnp.allclose(out_f32, ref, atol=1e-4, rtol=1e-4)

    # 2) Default production path: bf16 MXU operands / f32 accumulation, hoisted
    #    params, byte-sized auto tile, partial last tile (B not a multiple of
    #    the tile), bf16 output.
    B2 = 50
    x2 = jax.random.normal(kx2, (B2, D_IN), dtype=jnp.float32)
    ref2 = wnet_ref(x2, w1, b1, w2, b2)
    params = prepare_wnet_params(w1, b1, w2, b2)          # bf16 by default
    out_bf16 = jax.block_until_ready(wnet_apply(x2, params))
    assert out_bf16.shape == (B2, OUT)
    assert out_bf16.dtype == jnp.bfloat16
    assert jnp.allclose(out_bf16.astype(jnp.float32), ref2, atol=5e-2, rtol=5e-2)

    # 3) Convenience wrapper (prepares + applies in one call).
    out_conv = jax.block_until_ready(wnet(x, w1, b1, w2, b2))
    assert out_conv.shape == (B, OUT)
    assert jnp.allclose(out_conv.astype(jnp.float32), ref, atol=5e-2, rtol=5e-2)

    print("KERNEL_OK")
</pallas_src>

<mosaic_0001>
module attributes {stable_mosaic.version = 11 : i64} {
  func.func @wnet_kernel(%arg0: i32, %arg1: memref<8x16xf32, #tpu.memory_space<vmem>>, %arg2: memref<16x128xf32, #tpu.memory_space<vmem>>, %arg3: memref<1x128xf32, #tpu.memory_space<vmem>>, %arg4: memref<128x8xf32, #tpu.memory_space<vmem>>, %arg5: memref<1x8xf32, #tpu.memory_space<vmem>>, %arg6: memref<8x8xf32, #tpu.memory_space<vmem>>) attributes {dimension_semantics = [#tpu.dimension_semantics<parallel>], iteration_bounds = array<i64: 4>, scalar_prefetch = 0 : i64, scratch_operands = 0 : i64, tpu.core_type = #tpu.core_type<tc>, window_params = [{transform_indices = @transform_0, window_bounds = array<i64: 8, 16>}, {pipeline_mode = #tpu.pipeline_mode<synchronous>, transform_indices = @transform_1, window_bounds = array<i64: 16, 128>}, {pipeline_mode = #tpu.pipeline_mode<synchronous>, transform_indices = @transform_2, window_bounds = array<i64: 1, 128>}, {pipeline_mode = #tpu.pipeline_mode<synchronous>, transform_indices = @transform_3, window_bounds = array<i64: 128, 8>}, {pipeline_mode = #tpu.pipeline_mode<synchronous>, transform_indices = @transform_4, window_bounds = array<i64: 1, 8>}, {transform_indices = @transform_5, window_bounds = array<i64: 8, 8>}]} {
    %c0 = arith.constant 0 : index
    %c0_0 = arith.constant 0 : index
    %0 = vector.load %arg1[%c0, %c0_0] : memref<8x16xf32, #tpu.memory_space<vmem>>, vector<8x16xf32>
    %c0_1 = arith.constant 0 : index
    %c0_2 = arith.constant 0 : index
    %1 = vector.load %arg2[%c0_1, %c0_2] : memref<16x128xf32, #tpu.memory_space<vmem>>, vector<16x128xf32>
    %cst = arith.constant dense<0.000000e+00> : vector<8x128xf32>
    %2 = tpu.matmul %0, %1, %cst {dimension_numbers = #tpu.dot_dimension_numbers<[1], [0], [0], [1], [0, 0, 1, 1], [], []>} : vector<8x16xf32>, vector<16x128xf32>, vector<8x128xf32> -> vector<8x128xf32>
    %c0_3 = arith.constant 0 : index
    %c0_4 = arith.constant 0 : index
    %3 = vector.load %arg3[%c0_3, %c0_4] : memref<1x128xf32, #tpu.memory_space<vmem>>, vector<1x128xf32>
    %4 = vector.broadcast %3 : vector<1x128xf32> to vector<8x128xf32>
    %5 = arith.addf %2, %4 : vector<8x128xf32>
    %c0_5 = arith.constant 0 : index
    %c0_6 = arith.constant 0 : index
    %6 = vector.load %arg4[%c0_5, %c0_6] : memref<128x8xf32, #tpu.memory_space<vmem>>, vector<128x8xf32>
    %cst_7 = arith.constant dense<0.000000e+00> : vector<8x8xf32>
    %7 = tpu.matmul %5, %6, %cst_7 {dimension_numbers = #tpu.dot_dimension_numbers<[1], [0], [0], [1], [0, 0, 1, 1], [], []>} : vector<8x128xf32>, vector<128x8xf32>, vector<8x8xf32> -> vector<8x8xf32>
    %c0_8 = arith.constant 0 : index
    %c0_9 = arith.constant 0 : index
    %8 = vector.load %arg5[%c0_8, %c0_9] : memref<1x8xf32, #tpu.memory_space<vmem>>, vector<1x8xf32>
    %9 = vector.broadcast %8 : vector<1x8xf32> to vector<8x8xf32>
    %10 = arith.addf %7, %9 : vector<8x8xf32>
    %cst_10 = arith.constant 0.000000e+00 : f32
    %11 = vector.broadcast %cst_10 : f32 to vector<8x8xf32>
    %12 = arith.subf %11, %10 : vector<8x8xf32>
    %13 = math.exp %12 : vector<8x8xf32>
    %cst_11 = arith.constant 1.000000e+00 : f32
    %14 = vector.broadcast %cst_11 : f32 to vector<8x8xf32>
    %15 = arith.addf %14, %13 : vector<8x8xf32>
    %16 = tpu.reciprocal %15 : vector<8x8xf32> -> vector<8x8xf32>
    %c0_12 = arith.constant 0 : index
    %c0_13 = arith.constant 0 : index
    %17 = vector.load %arg6[%c0_12, %c0_13] : memref<8x8xf32, #tpu.memory_space<vmem>>, vector<8x8xf32>
    tpu.vector_store %arg6[%c0_12, %c0_13], %16 {strides = array<i32>} : memref<8x8xf32, #tpu.memory_space<vmem>>, vector<8x8xf32>,
    return
  }
  func.func @transform_0(%arg0: i32) -> (i32, i32) {
    %c0_i32 = arith.constant 0 : i32
    %c0_i32_0 = arith.constant 0 : i32
    return %arg0, %c0_i32 : i32, i32
  }
  func.func @transform_1(%arg0: i32) -> (i32, i32) {
    %c0_i32 = arith.constant 0 : i32
    %c0_i32_0 = arith.constant 0 : i32
    %c0_i32_1 = arith.constant 0 : i32
    return %c0_i32, %c0_i32_0 : i32, i32
  }
  func.func @transform_2(%arg0: i32) -> (i32, i32) {
    %c0_i32 = arith.constant 0 : i32
    %c0_i32_0 = arith.constant 0 : i32
    %c0_i32_1 = arith.constant 0 : i32
    return %c0_i32, %c0_i32_0 : i32, i32
  }
  func.func @transform_3(%arg0: i32) -> (i32, i32) {
    %c0_i32 = arith.constant 0 : i32
    %c0_i32_0 = arith.constant 0 : i32
    %c0_i32_1 = arith.constant 0 : i32
    return %c0_i32, %c0_i32_0 : i32, i32
  }
  func.func @transform_4(%arg0: i32) -> (i32, i32) {
    %c0_i32 = arith.constant 0 : i32
    %c0_i32_0 = arith.constant 0 : i32
    %c0_i32_1 = arith.constant 0 : i32
    return %c0_i32, %c0_i32_0 : i32, i32
  }
  func.func @transform_5(%arg0: i32) -> (i32, i32) {
    %c0_i32 = arith.constant 0 : i32
    %c0_i32_0 = arith.constant 0 : i32
    return %arg0, %c0_i32 : i32, i32
  }
}

</mosaic_0001>

<bundles_post_ra>
// kernel: tpu_custom_call.1
= control target key start
LH: loop header
LB: loop body
LE: loop exit
PB: predicated region body
PF: predicated region fallthrough
CT: control target
= control target key end

     0   :  { %s426_s18 = smov 0   ;;  %s510_s0 = inlined_call_operand.vmem [shape: f32[32,16], index: 0, kind: input, shape index: {}]   ;;  %s511_s1 = inlined_call_operand.vmem [shape: f32[16,128], index: 1, kind: input, shape index: {}]   ;;  %s512_s2 = inlined_call_operand.vmem [shape: f32[1,128], index: 2, kind: input, shape index: {}]   ;;  %s513_s3 = inlined_call_operand.vmem [shape: f32[128,8], index: 3, kind: input, shape index: {}]   ;;  %s514_s4 = inlined_call_operand.vmem [shape: f32[1,8], index: 4, kind: input, shape index: {}]   ;;  %s515_s5 = inlined_call_operand.vmem [shape: f32[32,8], index: 5, kind: output, shape index: {}]  }
   0x1 LB: > { %s364_s19 = sadd.s32 4294967295, %s394_s18   ;;  %p368_p0 = scmp.ge.s32.totalorder %s394_s18, 1  ;;  %s394_s18 = sphi %s426_s18, %s15_s18  }
   0x2   : > { %p186_p1 = scmp.lt.s32.totalorder %s394_s18, 5 }
   0x4   : > { %p187_p2 = pnand %p368_p0, %p186_p1 }
   0x5   : > { %p212_p3 = scmp.lt.s32.totalorder (!%p187_p2), %s364_s19, 3 }
   0x6   : > { %190 = sbr.rel (%p187_p2) target bundleno = 302 (0x12e), region = 40 }
   0xb   : > { %v222_v0 = vld [vmem:[%s511_s1 + $0x8] sm:$0xff]  ;;  %v221_v1 = vld [vmem:[%s511_s1] sm:$0xff]  ;;  %v266_v2 = vld [vmem:[%s513_s3 + $0x78] sm:$0xff]  ;;  %s517_s19 = smov (!%p212_p3, %s364_s19), 3  ;;  %vm227_vm0 = vcmask 130048   ;;  %vm309_vm4 = vcmask 64512  }
   0xc   : > { %245 = vmatpush.msra.mxu0 %v222_v0  ;;  %271 = vmatpush.msra.mxu1 %v266_v2  ;;  %v265_v3 = vld [vmem:[%s513_s3 + $0x70] sm:$0xff]  ;;  %v264_v4 = vld [vmem:[%s513_s3 + $0x68] sm:$0xff]  ;;  %s369_s30 = sshll.u32 %s517_s19, 3  ;;  %v263_v5 = vld [vmem:[%s513_s3 + $0x60] sm:$0xff] }
   0xd   : > { %s215_s10 = scalar_lea.vmem %s510_s0, %s369_s30  ;;  %v262_v7 = vld [vmem:[%s513_s3 + $0x58] sm:$0xff]  ;;  %v261_v8 = vld [vmem:[%s513_s3 + $0x50] sm:$0xff]  ;;  %v260_v9 = vld [vmem:[%s513_s3 + $0x48] sm:$0xff]  ;;  %s219_s21 = scalar_lea.vmem %s515_s5, %s369_s30 }
   0xe   : > { %246 = vmatpush.msra.mxu0 %v221_v1  ;;  %272 = vmatpush.msra.mxu1 %v265_v3  ;;  %v220_v6 = vld [vmem:[%s215_s10] sm:$0xff]  ;;  %v258_v11 = vld [vmem:[%s513_s3 + $0x38] sm:$0xff]  ;;  %v257_v12 = vld [vmem:[%s513_s3 + $0x30] sm:$0xff] }
   0xf   : > { %371 = vmatmul.msk.f32.vlgmr.msra.gmra.mxu0 %vm227_vm0, %v220_v6  ;;  %v259_v10 = vld [vmem:[%s513_s3 + $0x40] sm:$0xff]  ;;  %v256_v13 = vld [vmem:[%s513_s3 + $0x28] sm:$0xff]  ;;  %v254_v15 = vld [vmem:[%s513_s3 + $0x18] sm:$0xff] }
  0x10   : > { %273 = vmatpush.msra.mxu1 %v264_v4  ;;  %v255_v14 = vld [vmem:[%s513_s3 + $0x20] sm:$0xff]  ;;  %v253_v16 = vld [vmem:[%s513_s3 + $0x10] sm:$0xff]  ;;  %v252_v17 = vld [vmem:[%s513_s3 + $0x8] sm:$0xff] }
  0x11   : > { %v251_v18 = vld [vmem:[%s513_s3] sm:$0xff] }
  0x12   : > { %274 = vmatpush.msra.mxu1 %v263_v5  ;;  %v382_v19 = vld [vmem:[%s512_s2] ss:$0 sm:$0xff] }
  0x13   : > { %v383_v22 = vld [vmem:[%s514_s4] ss:$0 sm:$0xff] }
  0x14   : > { %275 = vmatpush.msra.mxu1 %v262_v7 }
  0x16   : > { %276 = vmatpush.msra.mxu1 %v261_v8 }
  0x18   : > { %277 = vmatpush.msra.mxu1 %v260_v9 }
  0x1a   : > { %278 = vmatpush.msra.mxu1 %v259_v10 }
  0x1c   : > { %279 = vmatpush.msra.mxu1 %v258_v11 }
  0x1e   : > { %280 = vmatpush.msra.mxu1 %v257_v12 }
  0x20   : > { %281 = vmatpush.msra.mxu1 %v256_v13 }
  0x22   : > { %282 = vmatpush.msra.mxu1 %v255_v14 }
  0x24   : > { %283 = vmatpush.msra.mxu1 %v254_v15 }
  0x26   : > { %284 = vmatpush.msra.mxu1 %v253_v16 }
  0x28   : > { %285 = vmatpush.msra.mxu1 %v252_v17 }
  0x2a   : > { %286 = vmatpush.msra.mxu1 %v251_v18 }
  0x8c   : > { %v248_v20 = vpop.f32.mrf.mxu0 }
  0x8d   : > { %v249_v21 = vadd.f32 %v382_v19, %v248_v20 }
  0x8f   : > { %287 = vmatmul.f32.vlgmr.msra.gmra.mxu1 %v249_v21 }
 0x10c   : > { %v288_v23 = vpop.f32.mrf.mxu1 }
 0x10d   : > { %v289_v24 = vadd.f32 %v383_v22, %v288_v23 }
 0x10f   : > { %v291_v25 = vsub.f32 0.0, %v289_v24 }
 0x111   : > { %v292_v26 = vmul.f32 1.442695, %v291_v25 }
 0x113   : > { %384 = vpow2.f32 %v292_v26 }
 0x119   : > { %v385_v27 = vpop.eup %384 }
 0x11a   : > { %v294_v28 = vadd.f32 1.0, %v385_v27 }
 0x11c   : > { %386 = vrcp.f32 %v294_v28  ;;  %v306_v32 = vand.u32 2147483648, %v294_v28  ;;  %v304_v34 = vand.u32 2147483647, %v294_v28  ;;  %vm300_vm2 = vweird.f32 %v294_v28 }
 0x11e   : > { %v307_v36 = vor.u32 1.1754944e-38, %v306_v32  ;;  %vm305_vm5 = vcmp.eq.f32.partialorder %v304_v34, 8.507059e+37 }
 0x122   : > { %v387_v29 = vpop.eup %386 }
 0x123   : > { %v296_v30 = vmul.f32 %v387_v29, %v294_v28  ;;  %vm301_vm1 = vweird.f32 %v387_v29 }
 0x124   : > { %vm302_vm3 = vmor %vm300_vm2, %vm301_vm1 }
 0x125   : > { %v297_v31 = vsub.f32 1.0, %v296_v30 }
 0x127   : > { %v298_v33 = vmul.f32 %v387_v29, %v297_v31 }
 0x129   : > { %v299_v35 = vadd.f32 %v387_v29, %v298_v33 }
 0x12b   : > { %v303_v37 = vsel %vm302_vm3, %v387_v29, %v299_v35 }
 0x12c   : > { %v308_v38 = vsel %vm305_vm5, %v307_v36, %v303_v37 }
 0x12d   : > { %310 = vst.msk [vmem:[%s219_s21] sm:$0xff] %vm309_vm4, %v308_v38 }
 0x12e PF: > { %s15_s18 = sadd.s32 1, %s394_s18  }
 0x12f   : > { %p12_p4 = scmp.ge.s32.totalorder %s15_s18, 6  }
 0x131   :  { %14 = sbr.rel (!%p12_p4) target bundleno = 1 (0x1), region = 70 }

</bundles_post_ra>
